<compile_context>
chip_gen: v7x
topology: tpu7x:2x2x1
jax: 0.10.0
libtpu: 0.0.40
codegen_flags: <defaults>
</compile_context>

<pallas_src>
import functools

import jax
import jax.numpy as jnp
from jax.experimental import pallas as pl
from jax.experimental.pallas import tpu as pltpu

_LANES = 128
_SUBLANES = 8
# 4096 rows x 128 lanes x 4 B = 2 MiB per f32 operand per grid step.
_DEFAULT_BLOCK_ROWS = 4096
_VMEM_LIMIT_BYTES = 32 * 1024 * 1024


def _dice_partials_kernel(steps, mask_last, n_ref, x_ref, t_ref,
                          inter_ref, sums_ref):
    """grid = (nc, steps): axis 0 = core split (parallel), axis 1 = streaming
    reduction (arbitrary).  Outputs are per-split (1, 8, 128) f32 partials for
    [sum(sigmoid(x)*t), sum(sigmoid(x)+t)], accumulated in-place (resident
    across the inner axis) and combined in the JAX wrapper."""
    c = pl.program_id(0)
    k = pl.program_id(1)
    br = x_ref.shape[0]

    @pl.when(k == 0)
    def _():
        inter_ref[...] = jnp.zeros_like(inter_ref)
        sums_ref[...] = jnp.zeros_like(sums_ref)

    x = x_ref[...].astype(jnp.float32)
    t = t_ref[...].astype(jnp.float32)
    # sigmoid(x) == 0.5 * tanh(0.5 * x) + 0.5  -> a single EUP transcendental.
    s = 0.5 * jnp.tanh(0.5 * x) + 0.5

    def accumulate(s_v, t_v):
        prod = s_v * t_v            # intersection partials
        both = s_v + t_v            # only sum(inputs)+sum(targets) is needed
        # Layout-preserving (br,128) -> (br/8, 8, 128); leading-axis sum is
        # pure vreg-to-vreg VPU adds (no XLU until the wrapper's tiny reduce).
        inter_ref[...] += jnp.sum(
            prod.reshape(br // _SUBLANES, _SUBLANES, _LANES), axis=0)[None]
        sums_ref[...] += jnp.sum(
            both.reshape(br // _SUBLANES, _SUBLANES, _LANES), axis=0)[None]

    if mask_last:
        # Only the globally-last block contains padding / out-of-bounds rows.
        is_last = jnp.logical_and(c == pl.num_programs(0) - 1,
                                  k == pl.num_programs(1) - 1)

        @pl.when(is_last)
        def _():
            n = n_ref[0]
            full_rows = n // _LANES
            rem = n - full_rows * _LANES
            row = jax.lax.broadcasted_iota(jnp.int32, (br, _LANES), 0)
            lane = jax.lax.broadcasted_iota(jnp.int32, (br, _LANES), 1)
            row_g = (c * steps + k) * br + row
            valid = (row_g < full_rows) | ((row_g == full_rows) & (lane < rem))
            accumulate(jnp.where(valid, s, 0.0), jnp.where(valid, t, 0.0))

        @pl.when(jnp.logical_not(is_last))
        def _():
            accumulate(s, t)
    else:
        accumulate(s, t)


def dice_loss(inputs, targets, smooth=1.0, block_rows=_DEFAULT_BLOCK_ROWS):
    """Pallas implementation of DiceLoss.forward(inputs, targets, smooth)."""
    # Keep native dtypes (bf16 logits / int or f32 masks); cast inside kernel.
    x = inputs.reshape(-1)
    t = targets.reshape(-1)
    n = x.shape[0]

    # Lane-dense (rows, 128) view; rows rounded up to a sublane multiple (8)
    # so every block folds into whole vregs.  Pad is at most 1023 elements;
    # padded / garbage lanes are masked in-kernel (last block only).
    rows = -(-n // _LANES)
    rows = -(-rows // _SUBLANES) * _SUBLANES
    pad = rows * _LANES - n
    if pad:
        x = jnp.pad(x, (0, pad))
        t = jnp.pad(t, (0, pad))
    x2 = x.reshape(rows, _LANES)
    t2 = t.reshape(rows, _LANES)

    assert block_rows % _SUBLANES == 0
    br = rows if rows <= block_rows else block_rows
    num_blocks = -(-rows // br)

    # Use both TensorCores (v7x) via a leading "parallel" axis; on single-TC
    # chips (v5e/v6e) this is just a serial loop with identical total work.
    nc = 2 if (num_blocks >= 2 and num_blocks % 2 == 0) else 1
    steps = num_blocks // nc

    # Tail masking only needed for padding / a partial last block, and only
    # the globally-last block ever pays for it.
    mask_last = (pad != 0) or (rows % br != 0)

    n_valid = jnp.asarray([n], dtype=jnp.int32)

    inter_p, sums_p = pl.pallas_call(
        functools.partial(_dice_partials_kernel, steps, mask_last),
        out_shape=(
            jax.ShapeDtypeStruct((nc, _SUBLANES, _LANES), jnp.float32),
            jax.ShapeDtypeStruct((nc, _SUBLANES, _LANES), jnp.float32),
        ),
        grid_spec=pltpu.PrefetchScalarGridSpec(
            num_scalar_prefetch=1,
            grid=(nc, steps),
            in_specs=[
                pl.BlockSpec((br, _LANES),
                             lambda c, k, n_ref: (c * steps + k, 0)),
                pl.BlockSpec((br, _LANES),
                             lambda c, k, n_ref: (c * steps + k, 0)),
            ],
            out_specs=[
                pl.BlockSpec((1, _SUBLANES, _LANES),
                             lambda c, k, n_ref: (c, 0, 0)),
                pl.BlockSpec((1, _SUBLANES, _LANES),
                             lambda c, k, n_ref: (c, 0, 0)),
            ],
        ),
        compiler_params=pltpu.CompilerParams(
            dimension_semantics=("parallel", "arbitrary"),
            vmem_limit_bytes=_VMEM_LIMIT_BYTES),
    )(n_valid, x2, t2)

    # Tiny finalize in JAX: 2*nc vregs of partials -> scalars -> dice.
    intersection = jnp.sum(inter_p)
    s_plus_t = jnp.sum(sums_p)
    dice = (2.0 * intersection + smooth) / (s_plus_t + smooth)
    return 1.0 - dice


def _dice_loss_ref(inputs, targets, smooth=1.0):
    s = jax.nn.sigmoid(inputs.reshape(-1).astype(jnp.float32))
    t = targets.reshape(-1).astype(jnp.float32)
    inter = jnp.sum(s * t)
    dice = (2.0 * inter + smooth) / (jnp.sum(s) + jnp.sum(t) + smooth)
    return 1.0 - dice


if __name__ == "__main__":
    key = jax.random.PRNGKey(0)
    k_in, k_tg = jax.random.split(key)

    # 1) Segmentation-head-like logits + binary mask (128-aligned, 1 block).
    x = jax.random.normal(k_in, (2, 4, 16, 16), dtype=jnp.float32)
    tg = (jax.random.uniform(k_tg, (2, 4, 16, 16)) > 0.5).astype(jnp.float32)
    out = jax.block_until_ready(dice_loss(x, tg, smooth=1.0))
    ref = _dice_loss_ref(x, tg, smooth=1.0)
    assert jnp.allclose(out, ref, atol=1e-5, rtol=1e-4), (out, ref)

    # 2) Non-128-aligned size (tail-mask path, single block).
    x2 = jax.random.normal(k_in, (3, 5, 13, 7), dtype=jnp.float32)
    tg2 = (jax.random.uniform(k_tg, (3, 5, 13, 7)) > 0.5).astype(jnp.float32)
    out2 = jax.block_until_ready(dice_loss(x2, tg2, smooth=1.0))
    ref2 = _dice_loss_ref(x2, tg2, smooth=1.0)
    assert jnp.allclose(out2, ref2, atol=1e-5, rtol=1e-4), (out2, ref2)

    # 3) Multi-block + dual-split + partial last block (small block_rows keeps
    #    the test cheap while exercising every kernel path).
    x3 = jax.random.normal(k_in, (1, 3, 500, 333), dtype=jnp.float32)
    tg3 = (jax.random.uniform(k_tg, (1, 3, 500, 333)) > 0.5).astype(jnp.float32)
    out3 = jax.block_until_ready(dice_loss(x3, tg3, smooth=1.0, block_rows=1024))
    ref3 = _dice_loss_ref(x3, tg3, smooth=1.0)
    assert jnp.allclose(out3, ref3, atol=1e-5, rtol=1e-4), (out3, ref3)

    print("KERNEL_OK")
</pallas_src>

<mosaic_0001>
module attributes {stable_mosaic.version = 11 : i64} {
  func.func @_dice_partials_kernel(%arg0: i32, %arg1: i32, %arg2: memref<1xi32, #tpu.memory_space<smem>>, %arg3: memref<16x128xf32, #tpu.memory_space<vmem>>, %arg4: memref<16x128xf32, #tpu.memory_space<vmem>>, %arg5: memref<1x8x128xf32, #tpu.memory_space<vmem>>, %arg6: memref<1x8x128xf32, #tpu.memory_space<vmem>>) attributes {dimension_semantics = [#tpu.dimension_semantics<parallel>, #tpu.dimension_semantics<arbitrary>], iteration_bounds = array<i64: 1, 1>, scalar_prefetch = 1 : i64, scratch_operands = 0 : i64, tpu.core_type = #tpu.core_type<tc>, window_params = [{transform_indices = @transform_0, window_bounds = array<i64: 16, 128>}, {transform_indices = @transform_1, window_bounds = array<i64: 16, 128>}, {transform_indices = @transform_2, window_bounds = array<i64: 1, 8, 128>}, {transform_indices = @transform_3, window_bounds = array<i64: 1, 8, 128>}]} {
    %c0_i32 = arith.constant 0 : i32
    %0 = arith.cmpi eq, %arg1, %c0_i32 : i32
    %1 = arith.extui %0 : i1 to i32
    %c0_i32_0 = arith.constant 0 : i32
    %2 = arith.cmpi ne, %1, %c0_i32_0 : i32
    scf.if %2 {
      %cst_20 = arith.constant 0.000000e+00 : f32
      %26 = vector.broadcast %cst_20 : f32 to vector<1x8x128xf32>
      %c0_21 = arith.constant 0 : index
      %c0_22 = arith.constant 0 : index
      %c0_23 = arith.constant 0 : index
      %27 = vector.load %arg5[%c0_21, %c0_22, %c0_23] : memref<1x8x128xf32, #tpu.memory_space<vmem>>, vector<1x8x128xf32>
      tpu.vector_store %arg5[%c0_21, %c0_22, %c0_23], %26 {strides = array<i32>} : memref<1x8x128xf32, #tpu.memory_space<vmem>>, vector<1x8x128xf32>,
      %cst_24 = arith.constant 0.000000e+00 : f32
      %28 = vector.broadcast %cst_24 : f32 to vector<1x8x128xf32>
      %c0_25 = arith.constant 0 : index
      %c0_26 = arith.constant 0 : index
      %c0_27 = arith.constant 0 : index
      %29 = vector.load %arg6[%c0_25, %c0_26, %c0_27] : memref<1x8x128xf32, #tpu.memory_space<vmem>>, vector<1x8x128xf32>
      tpu.vector_store %arg6[%c0_25, %c0_26, %c0_27], %28 {strides = array<i32>} : memref<1x8x128xf32, #tpu.memory_space<vmem>>, vector<1x8x128xf32>,
    } else {
    }
    %c0 = arith.constant 0 : index
    %c0_1 = arith.constant 0 : index
    %3 = vector.load %arg3[%c0, %c0_1] : memref<16x128xf32, #tpu.memory_space<vmem>>, vector<16x128xf32>
    %c0_2 = arith.constant 0 : index
    %c0_3 = arith.constant 0 : index
    %4 = vector.load %arg4[%c0_2, %c0_3] : memref<16x128xf32, #tpu.memory_space<vmem>>, vector<16x128xf32>
    %cst = arith.constant 5.000000e-01 : f32
    %5 = vector.broadcast %cst : f32 to vector<16x128xf32>
    %6 = arith.mulf %5, %3 : vector<16x128xf32>
    %7 = math.tanh %6 : vector<16x128xf32>
    %cst_4 = arith.constant 5.000000e-01 : f32
    %8 = vector.broadcast %cst_4 : f32 to vector<16x128xf32>
    %9 = arith.mulf %8, %7 : vector<16x128xf32>
    %cst_5 = arith.constant 5.000000e-01 : f32
    %10 = vector.broadcast %cst_5 : f32 to vector<16x128xf32>
    %11 = arith.addf %9, %10 : vector<16x128xf32>
    %12 = arith.mulf %11, %4 : vector<16x128xf32>
    %13 = arith.addf %11, %4 : vector<16x128xf32>
    %c0_6 = arith.constant 0 : index
    %c0_7 = arith.constant 0 : index
    %c0_8 = arith.constant 0 : index
    %14 = vector.load %arg5[%c0_6, %c0_7, %c0_8] : memref<1x8x128xf32, #tpu.memory_space<vmem>>, vector<1x8x128xf32>
    %15 = vector.shape_cast %12 : vector<16x128xf32> to vector<2x8x128xf32>
    %cst_9 = arith.constant dense<0.000000e+00> : vector<8x128xf32>
    %16 = vector.multi_reduction <add>, %15, %cst_9 [0] : vector<2x8x128xf32> to vector<8x128xf32>
    %17 = vector.shape_cast %16 : vector<8x128xf32> to vector<1x8x128xf32>
    %18 = arith.addf %14, %17 : vector<1x8x128xf32>
    %c0_10 = arith.constant 0 : index
    %c0_11 = arith.constant 0 : index
    %c0_12 = arith.constant 0 : index
    %19 = vector.load %arg5[%c0_10, %c0_11, %c0_12] : memref<1x8x128xf32, #tpu.memory_space<vmem>>, vector<1x8x128xf32>
    tpu.vector_store %arg5[%c0_10, %c0_11, %c0_12], %18 {strides = array<i32>} : memref<1x8x128xf32, #tpu.memory_space<vmem>>, vector<1x8x128xf32>,
    %c0_13 = arith.constant 0 : index
    %c0_14 = arith.constant 0 : index
    %c0_15 = arith.constant 0 : index
    %20 = vector.load %arg6[%c0_13, %c0_14, %c0_15] : memref<1x8x128xf32, #tpu.memory_space<vmem>>, vector<1x8x128xf32>
    %21 = vector.shape_cast %13 : vector<16x128xf32> to vector<2x8x128xf32>
    %cst_16 = arith.constant dense<0.000000e+00> : vector<8x128xf32>
    %22 = vector.multi_reduction <add>, %21, %cst_16 [0] : vector<2x8x128xf32> to vector<8x128xf32>
    %23 = vector.shape_cast %22 : vector<8x128xf32> to vector<1x8x128xf32>
    %24 = arith.addf %20, %23 : vector<1x8x128xf32>
    %c0_17 = arith.constant 0 : index
    %c0_18 = arith.constant 0 : index
    %c0_19 = arith.constant 0 : index
    %25 = vector.load %arg6[%c0_17, %c0_18, %c0_19] : memref<1x8x128xf32, #tpu.memory_space<vmem>>, vector<1x8x128xf32>
    tpu.vector_store %arg6[%c0_17, %c0_18, %c0_19], %24 {strides = array<i32>} : memref<1x8x128xf32, #tpu.memory_space<vmem>>, vector<1x8x128xf32>,
    return
  }
  func.func @transform_0(%arg0: i32, %arg1: i32, %arg2: memref<1xi32, #tpu.memory_space<smem>>) -> (i32, i32) {
    %c1_i32 = arith.constant 1 : i32
    %0 = arith.muli %arg0, %c1_i32 : i32
    %1 = arith.addi %0, %arg1 : i32
    %c0_i32 = arith.constant 0 : i32
    %c0_i32_0 = arith.constant 0 : i32
    return %1, %c0_i32 : i32, i32
  }
  func.func @transform_1(%arg0: i32, %arg1: i32, %arg2: memref<1xi32, #tpu.memory_space<smem>>) -> (i32, i32) {
    %c1_i32 = arith.constant 1 : i32
    %0 = arith.muli %arg0, %c1_i32 : i32
    %1 = arith.addi %0, %arg1 : i32
    %c0_i32 = arith.constant 0 : i32
    %c0_i32_0 = arith.constant 0 : i32
    return %1, %c0_i32 : i32, i32
  }
  func.func @transform_2(%arg0: i32, %arg1: i32, %arg2: memref<1xi32, #tpu.memory_space<smem>>) -> (i32, i32, i32) {
    %c0_i32 = arith.constant 0 : i32
    %c0_i32_0 = arith.constant 0 : i32
    %c0_i32_1 = arith.constant 0 : i32
    return %arg0, %c0_i32, %c0_i32_0 : i32, i32, i32
  }
  func.func @transform_3(%arg0: i32, %arg1: i32, %arg2: memref<1xi32, #tpu.memory_space<smem>>) -> (i32, i32, i32) {
    %c0_i32 = arith.constant 0 : i32
    %c0_i32_0 = arith.constant 0 : i32
    %c0_i32_1 = arith.constant 0 : i32
    return %arg0, %c0_i32, %c0_i32_0 : i32, i32, i32
  }
}

</mosaic_0001>

<bundles_post_ra>
// kernel: tpu_custom_call.1
= control target key start
LH: loop header
LB: loop body
LE: loop exit
PB: predicated region body
PF: predicated region fallthrough
CT: control target
= control target key end

     0   :  { %11 = vsyncpa [#allocation5], 0  ;;  %s303_s0 = inlined_call_operand.<no memory space> [shape: s32[1], index: 0, kind: input, shape index: {}]   ;;  %s304_s1 = inlined_call_operand.hbm [shape: f32[16,128], index: 1, kind: input, shape index: {}]   ;;  %s305_s2 = inlined_call_operand.hbm [shape: f32[16,128], index: 2, kind: input, shape index: {}]   ;;  %s306_s3 = inlined_call_operand.hbm [shape: f32[1,8,128], index: 3, kind: output, shape index: {0}]   ;;  %s307_s4 = inlined_call_operand.hbm [shape: f32[1,8,128], index: 4, kind: output, shape index: {1}]  }
   0x1   :  { %12 = vsyncpa [#allocation8], 0 }
   0x2   :  { %13 = vsyncpa [#allocation6], 0 }
   0x3   :  { %14 = vsyncpa [#allocation11], 0  ;;  %s224_s15 = smov [#allocation4]   ;;  %s128_s18 = scalar_lea.hbm %s304_s1, 256 }
   0x4   :  { %s24_s16 = sshll.u32 %s224_s15, 4  ;;  %p129_p0 = scmp.ne.s32.totalorder %s304_s1, %s128_s18  ;;  %s25_s16 = int_to_ptr.vmem [resolvable:$true] %s24_s16 }
   0x5   :  { %p132_p1 = scmp.lt.u32.totalorder %s128_s18, %s304_s1 }
   0x7   :  { %p134_p2 = pnand %p132_p1, %p129_p0 }
   0x9   :  { %137 = shalt.err (!%p134_p2)
}
   0xa   :  { %s138_s23 = scalar_lea.vmem %s25_s16, 256  ;;  %p143_p4 = scmp.lt.s32.totalorder %s25_s16, %s25_s16 }
   0xb   :  { %p139_p3 = scmp.ne.s32.totalorder %s25_s16, %s138_s23  ;;  %p144_p5 = scmp.lt.s32.totalorder %s138_s23, %s138_s23 }
   0xd   :  { %p145_p6 = por %p144_p5, %p143_p4 }
   0xf   :  { %p146_p7 = pnand %p145_p6, %p139_p3 }
  0x11   :  { %149 = shalt.err (!%p146_p7)
}
  0x12   :  { %s225_s24 = smov 128   ;;  %s226_s25 = smov 8  }
  0x13   :  { %30 = dma.hbm_to_vmem [thread:$0]  %s304_s1, 256, %s25_s16, [#allocation5], %s225_s24, %s225_s24, %s226_s25  }
  0x14   :  { %s227_s28 = smov [#allocation7]   ;;  %s150_s6 = scalar_lea.hbm %s305_s2, 256 }
  0x15   :  { %s40_s29 = sshll.u32 %s227_s28, 4  ;;  %p151_p8 = scmp.ne.s32.totalorder %s305_s2, %s150_s6  ;;  %s41_s29 = int_to_ptr.vmem [resolvable:$true] %s40_s29 }
  0x16   :  { %p154_p9 = scmp.lt.u32.totalorder %s150_s6, %s305_s2 }
  0x18   :  { %p156_p10 = pnand %p154_p9, %p151_p8 }
  0x1a   :  { %159 = shalt.err (!%p156_p10)
}
  0x1b   :  { %s160_s11 = scalar_lea.vmem %s41_s29, 256  ;;  %p165_p12 = scmp.lt.s32.totalorder %s41_s29, %s41_s29 }
  0x1c   :  { %p161_p11 = scmp.ne.s32.totalorder %s41_s29, %s160_s11  ;;  %p166_p13 = scmp.lt.s32.totalorder %s160_s11, %s160_s11 }
  0x1e   :  { %p167_p0 = por %p166_p13, %p165_p12 }
  0x20   :  { %p168_p1 = pnand %p167_p0, %p161_p11 }
  0x22   :  { %171 = shalt.err (!%p168_p1)
}
  0x23   :  { %46 = dma.hbm_to_vmem [thread:$0]  %s305_s2, 256, %s41_s29, [#allocation8], %s225_s24, %s225_s24, %s226_s25  }
  0x24   :  { %216 = dma.done.wait [#allocation5], 256  }
  0x25   :  { %217 = vsyncadd [#allocation5], 4294967040 }
  0x26   :  { %218 = dma.done.wait [#allocation8], 256  }
  0x27   :  { %219 = vsyncadd [#allocation8], 4294967040  ;;  %v63_v0 = vld [vmem:[#allocation4] sm:$0xff]  ;;  %v64_v1 = vld [vmem:[#allocation4 + $0x8] sm:$0xff]  ;;  %s228_s2 = smov [#allocation9]   ;;  %s229_s14 = smov [#allocation10]  }
  0x28   :  { %v67_v2 = vmul.f32 0.5, %v63_v0  ;;  %v68_v3 = vmul.f32 0.5, %v64_v1  ;;  %v65_v7 = vld [vmem:[#allocation7] sm:$0xff]  ;;  %v66_v9 = vld [vmem:[#allocation7 + $0x8] sm:$0xff]  ;;  %s93_s13 = sshll.u32 %s228_s2, 4  ;;  %s103_s15 = sshll.u32 %s229_s14, 4  ;;  %s94_s13 = int_to_ptr.vmem [resolvable:$true] %s93_s13  ;;  %s104_s15 = int_to_ptr.vmem [resolvable:$true] %s103_s15 }
  0x29   :  { %s172_s16 = scalar_lea.vmem %s94_s13, 128  ;;  %p177_p3 = scmp.lt.s32.totalorder %s94_s13, %s94_s13 }
  0x2a   :  { %124 = vtanh.f32 %v67_v2  ;;  %p173_p2 = scmp.ne.s32.totalorder %s94_s13, %s172_s16  ;;  %p178_p4 = scmp.lt.s32.totalorder %s172_s16, %s172_s16 }
  0x2b   :  { %126 = vtanh.f32 %v68_v3 }
  0x2c   :  { %p179_p5 = por %p178_p4, %p177_p3 }
  0x2e   :  { %p180_p6 = pnand %p179_p5, %p173_p2 }
  0x34   :  { %v125_v4 = vpop.eup %124 }
  0x35   :  { %v127_v5 = vpop.eup %126  ;;  %v71_v6 = vmul.f32 0.5, %v125_v4 }
  0x36   :  { %v72_v8 = vmul.f32 0.5, %v127_v5 }
  0x37   :  { %v73_v10 = vadd.f32 0.5, %v71_v6 }
  0x38   :  { %v74_v11 = vadd.f32 0.5, %v72_v8 }
  0x39   :  { %v75_v12 = vmul.f32 %v73_v10, %v65_v7  ;;  %v77_v13 = vadd.f32 %v73_v10, %v65_v7 }
  0x3a   :  { %v76_v14 = vmul.f32 %v74_v11, %v66_v9  ;;  %v78_v15 = vadd.f32 %v74_v11, %v66_v9 }
  0x3c   :  { %v80_v16 = vadd.f32 %v76_v14, %v75_v12  ;;  %v84_v17 = vadd.f32 %v78_v15, %v77_v13 }
  0x3e   :  { %82 = vst [vmem:[#allocation9] sm:$0xff] %v80_v16  ;;  %86 = vst [vmem:[#allocation10] sm:$0xff] %v84_v17 }
  0x3f   :  { %183 = shalt.err (!%p180_p6)
}
  0x40   :  { %s184_s18 = scalar_lea.hbm %s306_s3, 128 }
  0x41   :  { %p185_p7 = scmp.ne.s32.totalorder %s306_s3, %s184_s18  ;;  %p188_p8 = scmp.lt.u32.totalorder %s184_s18, %s306_s3 }
  0x43   :  { %p190_p9 = pnand %p188_p8, %p185_p7 }
  0x45   :  { %193 = shalt.err (!%p190_p9)
}
  0x46   :  { %96 = dma.vmem_to_hbm [thread:$0]  %s94_s13, 128, %s306_s3, [#allocation6]  }
  0x47   :  { %s194_s25 = scalar_lea.vmem %s104_s15, 128  ;;  %p199_p11 = scmp.lt.s32.totalorder %s104_s15, %s104_s15 }
  0x48   :  { %p195_p10 = scmp.ne.s32.totalorder %s104_s15, %s194_s25  ;;  %p200_p12 = scmp.lt.s32.totalorder %s194_s25, %s194_s25 }
  0x4a   :  { %p201_p13 = por %p200_p12, %p199_p11 }
  0x4c   :  { %p202_p0 = pnand %p201_p13, %p195_p10 }
  0x4e   :  { %205 = shalt.err (!%p202_p0)
}
  0x4f   :  { %s206_s28 = scalar_lea.hbm %s307_s4, 128 }
  0x50   :  { %p207_p1 = scmp.ne.s32.totalorder %s307_s4, %s206_s28  ;;  %p210_p2 = scmp.lt.u32.totalorder %s206_s28, %s307_s4 }
  0x52   :  { %p212_p3 = pnand %p210_p2, %p207_p1 }
  0x54   :  { %215 = shalt.err (!%p212_p3)
}
  0x55   :  { %106 = dma.vmem_to_hbm [thread:$0]  %s104_s15, 128, %s307_s4, [#allocation11]  }
  0x56   :  { %220 = dma.done.wait [#allocation6], 128  }
  0x57   :  { %221 = vsyncadd [#allocation6], 4294967168 }
  0x58   :  { %222 = dma.done.wait [#allocation11], 128  }
  0x59   :  { %223 = vsyncadd [#allocation11], 4294967168 }
  0x5a   :  { %113 = vsyncpa [#allocation5], 1 }
  0x5b   :  { %114 = vsyncpa [#allocation8], 1 }
  0x5c   :  { %115 = vsyncpa [#allocation6], 1 }
  0x5d   :  { %116 = vsyncpa [#allocation11], 1 }

</bundles_post_ra>
